<compile_context>
chip_gen: v7x
topology: tpu7x:2x2x1
jax: 0.10.0
libtpu: 0.0.40
codegen_flags: <defaults>
</compile_context>

<pallas_src>
import math

import jax
import jax.numpy as jnp
from jax.experimental import pallas as pl
from jax.experimental.pallas import tpu as pltpu

# ----------------------------- problem sizes --------------------------------
B = 2            # batch
N = 8            # sequence length
DIM = 64         # model dim
HEADS = 4
DHEAD = 16
INNER = HEADS * DHEAD          # 64  -> project_out == True
SCALE = DHEAD ** (-0.5)


# ------------------------------ fused kernel --------------------------------
def _dconv_attn_kernel(x_ref, wqkv_ref, dw_ref, db_ref, wout_ref, bout_ref, o_ref):
    x = x_ref[0]                                             # (N, DIM)
    n = x.shape[0]

    # ---- fused q/k/v projection (single MXU matmul, 3*INNER lanes wide) ----
    qkv = jnp.dot(x, wqkv_ref[...], preferred_element_type=jnp.float32)   # (N, 3I)

    # ---- depthwise (3,1) conv along the sequence axis, 'same' zero padding.
    # Shift matrices built from iota give qkv[n-1] / qkv[n+1] with the zero
    # boundary rows built in (padding folded into the kernel, no jnp.pad glue).
    r = jax.lax.broadcasted_iota(jnp.int32, (n, n), 0)
    c = jax.lax.broadcasted_iota(jnp.int32, (n, n), 1)
    s_prev = (c == r - 1).astype(jnp.float32)                # row n picks n-1
    s_next = (c == r + 1).astype(jnp.float32)                # row n picks n+1
    qkv_m1 = jnp.dot(s_prev, qkv, preferred_element_type=jnp.float32)
    qkv_p1 = jnp.dot(s_next, qkv, preferred_element_type=jnp.float32)

    dw0 = dw_ref[0:1, :]                                     # (1, 3I) tap at t-1
    dw1 = dw_ref[1:2, :]                                     # tap at t
    dw2 = dw_ref[2:3, :]                                     # tap at t+1
    qkv = dw0 * qkv_m1 + dw1 * qkv + dw2 * qkv_p1 + db_ref[...]

    q = qkv[:, 0 * INNER:1 * INNER]
    k = qkv[:, 1 * INNER:2 * INNER]
    v = qkv[:, 2 * INNER:3 * INNER]

    # ---- per-head attention; fold the head output straight into W_out so the
    # (h d) concat never materializes (heads loop is statically unrolled).
    acc = jnp.zeros((n, DIM), jnp.float32)
    for h in range(HEADS):
        sl = slice(h * DHEAD, (h + 1) * DHEAD)
        qh, kh, vh = q[:, sl], k[:, sl], v[:, sl]
        dots = jax.lax.dot_general(qh, kh, (((1,), (1,)), ((), ())),
                                   preferred_element_type=jnp.float32) * SCALE
        m = jnp.max(dots, axis=-1, keepdims=True)
        e = jnp.exp(dots - m)
        p = e / jnp.sum(e, axis=-1, keepdims=True)           # attention (dropout = id)
        oh = jnp.dot(p, vh, preferred_element_type=jnp.float32)
        acc = acc + jnp.dot(oh, wout_ref[sl, :], preferred_element_type=jnp.float32)

    o_ref[0] = acc + bout_ref[...]


# ------------------------------ wrapper --------------------------------------
def dconv_attention(x, params):
    Bb, Nn, Dd = x.shape
    I3 = 3 * INNER

    # Expand per-head depthwise taps/bias to per-channel and concat q|k|v so the
    # conv runs over the whole qkv slab in one shot (trace-time glue only).
    def expand(w, b):                                        # (H,3),(H,) -> (3,I),(I,)
        return jnp.repeat(w.T, DHEAD, axis=1), jnp.repeat(b, DHEAD)

    wq, bq = expand(params["dwq_w"], params["dwq_b"])
    wk, bk = expand(params["dwk_w"], params["dwk_b"])
    wv, bv = expand(params["dwv_w"], params["dwv_b"])
    dw = jnp.concatenate([wq, wk, wv], axis=1)               # (3, 3I)
    db = jnp.concatenate([bq, bk, bv])[None, :]              # (1, 3I)
    b_out = params["b_out"].reshape(1, DIM)

    return pl.pallas_call(
        _dconv_attn_kernel,
        grid=(Bb,),
        in_specs=[
            pl.BlockSpec((1, Nn, Dd), lambda b: (b, 0, 0)),      # x (per-batch block)
            pl.BlockSpec((Dd, I3), lambda b: (0, 0)),            # W_qkv (VMEM-resident)
            pl.BlockSpec((3, I3), lambda b: (0, 0)),             # depthwise taps
            pl.BlockSpec((1, I3), lambda b: (0, 0)),             # depthwise bias
            pl.BlockSpec((INNER, Dd), lambda b: (0, 0)),         # W_out
            pl.BlockSpec((1, Dd), lambda b: (0, 0)),             # b_out
        ],
        out_specs=pl.BlockSpec((1, Nn, Dd), lambda b: (b, 0, 0)),
        out_shape=jax.ShapeDtypeStruct((Bb, Nn, DIM), jnp.float32),
        compiler_params=pltpu.CompilerParams(dimension_semantics=("parallel",)),
    )(x, params["w_qkv"], dw, db, params["w_out"], b_out)


# --------------------------- pure-JAX reference -------------------------------
def ref_forward(x, params):
    hp = jax.lax.Precision.HIGHEST
    Bb, Nn, _ = x.shape
    qkv = jnp.einsum("bnd,de->bne", x, params["w_qkv"], precision=hp)
    q, k, v = jnp.split(qkv, 3, axis=-1)

    def to_heads(t):
        return t.reshape(Bb, Nn, HEADS, DHEAD).transpose(0, 2, 1, 3)   # (B,H,N,Dh)

    q, k, v = to_heads(q), to_heads(k), to_heads(v)

    def dconv(t, w, b):   # Conv2d(H, H, (3,1), groups=H, padding='same')
        tp = jnp.pad(t, ((0, 0), (0, 0), (1, 1), (0, 0)))
        return (w[None, :, 0, None, None] * tp[:, :, 0:Nn]
                + w[None, :, 1, None, None] * tp[:, :, 1:Nn + 1]
                + w[None, :, 2, None, None] * tp[:, :, 2:Nn + 2]
                + b[None, :, None, None])

    q = dconv(q, params["dwq_w"], params["dwq_b"])
    k = dconv(k, params["dwk_w"], params["dwk_b"])
    v = dconv(v, params["dwv_w"], params["dwv_b"])

    dots = jnp.einsum("bhnd,bhmd->bhnm", q, k, precision=hp) * SCALE
    attn = jax.nn.softmax(dots, axis=-1)
    out = jnp.einsum("bhnm,bhmd->bhnd", attn, v, precision=hp)
    out = out.transpose(0, 2, 1, 3).reshape(Bb, Nn, INNER)
    return jnp.einsum("bni,id->bnd", out, params["w_out"], precision=hp) + params["b_out"]


# --------------------------------- main ---------------------------------------
if __name__ == "__main__":
    keys = jax.random.split(jax.random.PRNGKey(0), 10)
    x = jax.random.normal(keys[0], (B, N, DIM), jnp.float32)
    params = dict(
        w_qkv=(jax.random.normal(keys[1], (DIM, 3 * INNER)) / math.sqrt(DIM)).astype(jnp.float32),
        dwq_w=(0.3 * jax.random.normal(keys[2], (HEADS, 3))).astype(jnp.float32),
        dwq_b=(0.1 * jax.random.normal(keys[3], (HEADS,))).astype(jnp.float32),
        dwk_w=(0.3 * jax.random.normal(keys[4], (HEADS, 3))).astype(jnp.float32),
        dwk_b=(0.1 * jax.random.normal(keys[5], (HEADS,))).astype(jnp.float32),
        dwv_w=(0.3 * jax.random.normal(keys[6], (HEADS, 3))).astype(jnp.float32),
        dwv_b=(0.1 * jax.random.normal(keys[7], (HEADS,))).astype(jnp.float32),
        w_out=(jax.random.normal(keys[8], (INNER, DIM)) / math.sqrt(INNER)).astype(jnp.float32),
        b_out=(0.1 * jax.random.normal(keys[9], (DIM,))).astype(jnp.float32),
    )

    fwd = jax.jit(dconv_attention)
    out = fwd(x, params)
    jax.block_until_ready(out)

    ref = ref_forward(x, params)
    assert out.shape == (B, N, DIM), out.shape
    assert bool(jnp.all(jnp.isfinite(out)))
    assert bool(jnp.allclose(out, ref, atol=2e-2, rtol=2e-2)), float(jnp.max(jnp.abs(out - ref)))
    print("KERNEL_OK")
</pallas_src>

<mosaic_0001>
module attributes {stable_mosaic.version = 11 : i64} {
  func.func @_dconv_attn_kernel(%arg0: i32, %arg1: memref<1x8x64xf32, #tpu.memory_space<vmem>>, %arg2: memref<64x192xf32, #tpu.memory_space<vmem>>, %arg3: memref<3x192xf32, #tpu.memory_space<vmem>>, %arg4: memref<1x192xf32, #tpu.memory_space<vmem>>, %arg5: memref<64x64xf32, #tpu.memory_space<vmem>>, %arg6: memref<1x64xf32, #tpu.memory_space<vmem>>, %arg7: memref<1x8x64xf32, #tpu.memory_space<vmem>>) attributes {dimension_semantics = [#tpu.dimension_semantics<parallel>], iteration_bounds = array<i64: 2>, scalar_prefetch = 0 : i64, scratch_operands = 0 : i64, tpu.core_type = #tpu.core_type<tc>, window_params = [{transform_indices = @transform_0, window_bounds = array<i64: 1, 8, 64>}, {pipeline_mode = #tpu.pipeline_mode<synchronous>, transform_indices = @transform_1, window_bounds = array<i64: 64, 192>}, {pipeline_mode = #tpu.pipeline_mode<synchronous>, transform_indices = @transform_2, window_bounds = array<i64: 3, 192>}, {pipeline_mode = #tpu.pipeline_mode<synchronous>, transform_indices = @transform_3, window_bounds = array<i64: 1, 192>}, {pipeline_mode = #tpu.pipeline_mode<synchronous>, transform_indices = @transform_4, window_bounds = array<i64: 64, 64>}, {pipeline_mode = #tpu.pipeline_mode<synchronous>, transform_indices = @transform_5, window_bounds = array<i64: 1, 64>}, {transform_indices = @transform_6, window_bounds = array<i64: 1, 8, 64>}]} {
    %c0 = arith.constant 0 : index
    %c0_0 = arith.constant 0 : index
    %c0_1 = arith.constant 0 : index
    %0 = vector.load %arg1[%c0, %c0_0, %c0_1] : memref<1x8x64xf32, #tpu.memory_space<vmem>>, vector<1x8x64xf32>
    %1 = vector.shape_cast %0 : vector<1x8x64xf32> to vector<8x64xf32>
    %c0_2 = arith.constant 0 : index
    %c0_3 = arith.constant 0 : index
    %2 = vector.load %arg2[%c0_2, %c0_3] : memref<64x192xf32, #tpu.memory_space<vmem>>, vector<64x192xf32>
    %cst = arith.constant dense<0.000000e+00> : vector<8x192xf32>
    %3 = tpu.matmul %1, %2, %cst {dimension_numbers = #tpu.dot_dimension_numbers<[1], [0], [0], [1], [0, 0, 1, 1], [], []>} : vector<8x64xf32>, vector<64x192xf32>, vector<8x192xf32> -> vector<8x192xf32>
    %4 = tpu.iota {dimensions = array<i32: 0>} : vector<8x8xi32>
    %5 = tpu.iota {dimensions = array<i32: 1>} : vector<8x8xi32>
    %c1_i32 = arith.constant 1 : i32
    %6 = vector.broadcast %c1_i32 : i32 to vector<8x8xi32>
    %7 = arith.subi %4, %6 : vector<8x8xi32>
    %8 = arith.cmpi eq, %5, %7 : vector<8x8xi32>
    %9 = arith.extui %8 : vector<8x8xi1> to vector<8x8xi32>
    %10 = arith.sitofp %9 : vector<8x8xi32> to vector<8x8xf32>
    %c1_i32_4 = arith.constant 1 : i32
    %11 = vector.broadcast %c1_i32_4 : i32 to vector<8x8xi32>
    %12 = arith.addi %4, %11 : vector<8x8xi32>
    %13 = arith.cmpi eq, %5, %12 : vector<8x8xi32>
    %14 = arith.extui %13 : vector<8x8xi1> to vector<8x8xi32>
    %15 = arith.sitofp %14 : vector<8x8xi32> to vector<8x8xf32>
    %cst_5 = arith.constant dense<0.000000e+00> : vector<8x192xf32>
    %16 = tpu.matmul %10, %3, %cst_5 {dimension_numbers = #tpu.dot_dimension_numbers<[1], [0], [0], [1], [0, 0, 1, 1], [], []>} : vector<8x8xf32>, vector<8x192xf32>, vector<8x192xf32> -> vector<8x192xf32>
    %cst_6 = arith.constant dense<0.000000e+00> : vector<8x192xf32>
    %17 = tpu.matmul %15, %3, %cst_6 {dimension_numbers = #tpu.dot_dimension_numbers<[1], [0], [0], [1], [0, 0, 1, 1], [], []>} : vector<8x8xf32>, vector<8x192xf32>, vector<8x192xf32> -> vector<8x192xf32>
    %c0_7 = arith.constant 0 : index
    %c0_8 = arith.constant 0 : index
    %18 = vector.load %arg3[%c0_7, %c0_8] : memref<3x192xf32, #tpu.memory_space<vmem>>, vector<1x192xf32>
    %c1 = arith.constant 1 : index
    %c0_9 = arith.constant 0 : index
    %19 = vector.load %arg3[%c1, %c0_9] : memref<3x192xf32, #tpu.memory_space<vmem>>, vector<1x192xf32>
    %c2 = arith.constant 2 : index
    %c0_10 = arith.constant 0 : index
    %20 = vector.load %arg3[%c2, %c0_10] : memref<3x192xf32, #tpu.memory_space<vmem>>, vector<1x192xf32>
    %21 = vector.broadcast %18 : vector<1x192xf32> to vector<8x192xf32>
    %22 = arith.mulf %21, %16 : vector<8x192xf32>
    %23 = vector.broadcast %19 : vector<1x192xf32> to vector<8x192xf32>
    %24 = arith.mulf %23, %3 : vector<8x192xf32>
    %25 = arith.addf %22, %24 : vector<8x192xf32>
    %26 = vector.broadcast %20 : vector<1x192xf32> to vector<8x192xf32>
    %27 = arith.mulf %26, %17 : vector<8x192xf32>
    %28 = arith.addf %25, %27 : vector<8x192xf32>
    %c0_11 = arith.constant 0 : index
    %c0_12 = arith.constant 0 : index
    %29 = vector.load %arg4[%c0_11, %c0_12] : memref<1x192xf32, #tpu.memory_space<vmem>>, vector<1x192xf32>
    %30 = vector.broadcast %29 : vector<1x192xf32> to vector<8x192xf32>
    %31 = arith.addf %28, %30 : vector<8x192xf32>
    %32 = vector.extract_strided_slice %31 {offsets = [0, 0], sizes = [8, 64], strides = [1, 1]} : vector<8x192xf32> to vector<8x64xf32>
    %33 = vector.extract_strided_slice %31 {offsets = [0, 64], sizes = [8, 64], strides = [1, 1]} : vector<8x192xf32> to vector<8x64xf32>
    %34 = vector.extract_strided_slice %31 {offsets = [0, 128], sizes = [8, 64], strides = [1, 1]} : vector<8x192xf32> to vector<8x64xf32>
    %cst_13 = arith.constant 0.000000e+00 : f32
    %35 = vector.broadcast %cst_13 : f32 to vector<8x64xf32>
    %36 = vector.extract_strided_slice %32 {offsets = [0, 0], sizes = [8, 16], strides = [1, 1]} : vector<8x64xf32> to vector<8x16xf32>
    %37 = vector.extract_strided_slice %33 {offsets = [0, 0], sizes = [8, 16], strides = [1, 1]} : vector<8x64xf32> to vector<8x16xf32>
    %38 = vector.extract_strided_slice %34 {offsets = [0, 0], sizes = [8, 16], strides = [1, 1]} : vector<8x64xf32> to vector<8x16xf32>
    %cst_14 = arith.constant dense<0.000000e+00> : vector<8x8xf32>
    %39 = tpu.matmul %36, %37, %cst_14 {dimension_numbers = #tpu.dot_dimension_numbers<[1], [1], [0], [0], [0, 0, 1, 0], [], []>} : vector<8x16xf32>, vector<8x16xf32>, vector<8x8xf32> -> vector<8x8xf32>
    %cst_15 = arith.constant 2.500000e-01 : f32
    %40 = vector.broadcast %cst_15 : f32 to vector<8x8xf32>
    %41 = arith.mulf %39, %40 : vector<8x8xf32>
    %cst_16 = arith.constant dense<0xFF800000> : vector<8xf32>
    %42 = vector.multi_reduction <maximumf>, %41, %cst_16 [1] : vector<8x8xf32> to vector<8xf32>
    %43 = vector.shape_cast %42 : vector<8xf32> to vector<8x1xf32>
    %44 = vector.broadcast %43 : vector<8x1xf32> to vector<8x8xf32>
    %45 = arith.subf %41, %44 : vector<8x8xf32>
    %46 = math.exp %45 : vector<8x8xf32>
    %cst_17 = arith.constant dense<0.000000e+00> : vector<8xf32>
    %47 = vector.multi_reduction <add>, %46, %cst_17 [1] : vector<8x8xf32> to vector<8xf32>
    %48 = vector.shape_cast %47 : vector<8xf32> to vector<8x1xf32>
    %49 = vector.broadcast %48 : vector<8x1xf32> to vector<8x8xf32>
    %50 = arith.divf %46, %49 : vector<8x8xf32>
    %cst_18 = arith.constant dense<0.000000e+00> : vector<8x16xf32>
    %51 = tpu.matmul %50, %38, %cst_18 {dimension_numbers = #tpu.dot_dimension_numbers<[1], [0], [0], [1], [0, 0, 1, 1], [], []>} : vector<8x8xf32>, vector<8x16xf32>, vector<8x16xf32> -> vector<8x16xf32>
    %c0_19 = arith.constant 0 : index
    %c0_20 = arith.constant 0 : index
    %52 = vector.load %arg5[%c0_19, %c0_20] : memref<64x64xf32, #tpu.memory_space<vmem>>, vector<16x64xf32>
    %cst_21 = arith.constant dense<0.000000e+00> : vector<8x64xf32>
    %53 = tpu.matmul %51, %52, %cst_21 {dimension_numbers = #tpu.dot_dimension_numbers<[1], [0], [0], [1], [0, 0, 1, 1], [], []>} : vector<8x16xf32>, vector<16x64xf32>, vector<8x64xf32> -> vector<8x64xf32>
    %54 = arith.addf %35, %53 : vector<8x64xf32>
    %55 = vector.extract_strided_slice %32 {offsets = [0, 16], sizes = [8, 16], strides = [1, 1]} : vector<8x64xf32> to vector<8x16xf32>
    %56 = vector.extract_strided_slice %33 {offsets = [0, 16], sizes = [8, 16], strides = [1, 1]} : vector<8x64xf32> to vector<8x16xf32>
    %57 = vector.extract_strided_slice %34 {offsets = [0, 16], sizes = [8, 16], strides = [1, 1]} : vector<8x64xf32> to vector<8x16xf32>
    %cst_22 = arith.constant dense<0.000000e+00> : vector<8x8xf32>
    %58 = tpu.matmul %55, %56, %cst_22 {dimension_numbers = #tpu.dot_dimension_numbers<[1], [1], [0], [0], [0, 0, 1, 0], [], []>} : vector<8x16xf32>, vector<8x16xf32>, vector<8x8xf32> -> vector<8x8xf32>
    %cst_23 = arith.constant 2.500000e-01 : f32
    %59 = vector.broadcast %cst_23 : f32 to vector<8x8xf32>
    %60 = arith.mulf %58, %59 : vector<8x8xf32>
    %cst_24 = arith.constant dense<0xFF800000> : vector<8xf32>
    %61 = vector.multi_reduction <maximumf>, %60, %cst_24 [1] : vector<8x8xf32> to vector<8xf32>
    %62 = vector.shape_cast %61 : vector<8xf32> to vector<8x1xf32>
    %63 = vector.broadcast %62 : vector<8x1xf32> to vector<8x8xf32>
    %64 = arith.subf %60, %63 : vector<8x8xf32>
    %65 = math.exp %64 : vector<8x8xf32>
    %cst_25 = arith.constant dense<0.000000e+00> : vector<8xf32>
    %66 = vector.multi_reduction <add>, %65, %cst_25 [1] : vector<8x8xf32> to vector<8xf32>
    %67 = vector.shape_cast %66 : vector<8xf32> to vector<8x1xf32>
    %68 = vector.broadcast %67 : vector<8x1xf32> to vector<8x8xf32>
    %69 = arith.divf %65, %68 : vector<8x8xf32>
    %cst_26 = arith.constant dense<0.000000e+00> : vector<8x16xf32>
    %70 = tpu.matmul %69, %57, %cst_26 {dimension_numbers = #tpu.dot_dimension_numbers<[1], [0], [0], [1], [0, 0, 1, 1], [], []>} : vector<8x8xf32>, vector<8x16xf32>, vector<8x16xf32> -> vector<8x16xf32>
    %c16 = arith.constant 16 : index
    %c0_27 = arith.constant 0 : index
    %71 = vector.load %arg5[%c16, %c0_27] : memref<64x64xf32, #tpu.memory_space<vmem>>, vector<16x64xf32>
    %cst_28 = arith.constant dense<0.000000e+00> : vector<8x64xf32>
    %72 = tpu.matmul %70, %71, %cst_28 {dimension_numbers = #tpu.dot_dimension_numbers<[1], [0], [0], [1], [0, 0, 1, 1], [], []>} : vector<8x16xf32>, vector<16x64xf32>, vector<8x64xf32> -> vector<8x64xf32>
    %73 = arith.addf %54, %72 : vector<8x64xf32>
    %74 = vector.extract_strided_slice %32 {offsets = [0, 32], sizes = [8, 16], strides = [1, 1]} : vector<8x64xf32> to vector<8x16xf32>
    %75 = vector.extract_strided_slice %33 {offsets = [0, 32], sizes = [8, 16], strides = [1, 1]} : vector<8x64xf32> to vector<8x16xf32>
    %76 = vector.extract_strided_slice %34 {offsets = [0, 32], sizes = [8, 16], strides = [1, 1]} : vector<8x64xf32> to vector<8x16xf32>
    %cst_29 = arith.constant dense<0.000000e+00> : vector<8x8xf32>
    %77 = tpu.matmul %74, %75, %cst_29 {dimension_numbers = #tpu.dot_dimension_numbers<[1], [1], [0], [0], [0, 0, 1, 0], [], []>} : vector<8x16xf32>, vector<8x16xf32>, vector<8x8xf32> -> vector<8x8xf32>
    %cst_30 = arith.constant 2.500000e-01 : f32
    %78 = vector.broadcast %cst_30 : f32 to vector<8x8xf32>
    %79 = arith.mulf %77, %78 : vector<8x8xf32>
    %cst_31 = arith.constant dense<0xFF800000> : vector<8xf32>
    %80 = vector.multi_reduction <maximumf>, %79, %cst_31 [1] : vector<8x8xf32> to vector<8xf32>
    %81 = vector.shape_cast %80 : vector<8xf32> to vector<8x1xf32>
    %82 = vector.broadcast %81 : vector<8x1xf32> to vector<8x8xf32>
    %83 = arith.subf %79, %82 : vector<8x8xf32>
    %84 = math.exp %83 : vector<8x8xf32>
    %cst_32 = arith.constant dense<0.000000e+00> : vector<8xf32>
    %85 = vector.multi_reduction <add>, %84, %cst_32 [1] : vector<8x8xf32> to vector<8xf32>
    %86 = vector.shape_cast %85 : vector<8xf32> to vector<8x1xf32>
    %87 = vector.broadcast %86 : vector<8x1xf32> to vector<8x8xf32>
    %88 = arith.divf %84, %87 : vector<8x8xf32>
    %cst_33 = arith.constant dense<0.000000e+00> : vector<8x16xf32>
    %89 = tpu.matmul %88, %76, %cst_33 {dimension_numbers = #tpu.dot_dimension_numbers<[1], [0], [0], [1], [0, 0, 1, 1], [], []>} : vector<8x8xf32>, vector<8x16xf32>, vector<8x16xf32> -> vector<8x16xf32>
    %c32 = arith.constant 32 : index
    %c0_34 = arith.constant 0 : index
    %90 = vector.load %arg5[%c32, %c0_34] : memref<64x64xf32, #tpu.memory_space<vmem>>, vector<16x64xf32>
    %cst_35 = arith.constant dense<0.000000e+00> : vector<8x64xf32>
    %91 = tpu.matmul %89, %90, %cst_35 {dimension_numbers = #tpu.dot_dimension_numbers<[1], [0], [0], [1], [0, 0, 1, 1], [], []>} : vector<8x16xf32>, vector<16x64xf32>, vector<8x64xf32> -> vector<8x64xf32>
    %92 = arith.addf %73, %91 : vector<8x64xf32>
    %93 = vector.extract_strided_slice %32 {offsets = [0, 48], sizes = [8, 16], strides = [1, 1]} : vector<8x64xf32> to vector<8x16xf32>
    %94 = vector.extract_strided_slice %33 {offsets = [0, 48], sizes = [8, 16], strides = [1, 1]} : vector<8x64xf32> to vector<8x16xf32>
    %95 = vector.extract_strided_slice %34 {offsets = [0, 48], sizes = [8, 16], strides = [1, 1]} : vector<8x64xf32> to vector<8x16xf32>
    %cst_36 = arith.constant dense<0.000000e+00> : vector<8x8xf32>
    %96 = tpu.matmul %93, %94, %cst_36 {dimension_numbers = #tpu.dot_dimension_numbers<[1], [1], [0], [0], [0, 0, 1, 0], [], []>} : vector<8x16xf32>, vector<8x16xf32>, vector<8x8xf32> -> vector<8x8xf32>
    %cst_37 = arith.constant 2.500000e-01 : f32
    %97 = vector.broadcast %cst_37 : f32 to vector<8x8xf32>
    %98 = arith.mulf %96, %97 : vector<8x8xf32>
    %cst_38 = arith.constant dense<0xFF800000> : vector<8xf32>
    %99 = vector.multi_reduction <maximumf>, %98, %cst_38 [1] : vector<8x8xf32> to vector<8xf32>
    %100 = vector.shape_cast %99 : vector<8xf32> to vector<8x1xf32>
    %101 = vector.broadcast %100 : vector<8x1xf32> to vector<8x8xf32>
    %102 = arith.subf %98, %101 : vector<8x8xf32>
    %103 = math.exp %102 : vector<8x8xf32>
    %cst_39 = arith.constant dense<0.000000e+00> : vector<8xf32>
    %104 = vector.multi_reduction <add>, %103, %cst_39 [1] : vector<8x8xf32> to vector<8xf32>
    %105 = vector.shape_cast %104 : vector<8xf32> to vector<8x1xf32>
    %106 = vector.broadcast %105 : vector<8x1xf32> to vector<8x8xf32>
    %107 = arith.divf %103, %106 : vector<8x8xf32>
    %cst_40 = arith.constant dense<0.000000e+00> : vector<8x16xf32>
    %108 = tpu.matmul %107, %95, %cst_40 {dimension_numbers = #tpu.dot_dimension_numbers<[1], [0], [0], [1], [0, 0, 1, 1], [], []>} : vector<8x8xf32>, vector<8x16xf32>, vector<8x16xf32> -> vector<8x16xf32>
    %c48 = arith.constant 48 : index
    %c0_41 = arith.constant 0 : index
    %109 = vector.load %arg5[%c48, %c0_41] : memref<64x64xf32, #tpu.memory_space<vmem>>, vector<16x64xf32>
    %cst_42 = arith.constant dense<0.000000e+00> : vector<8x64xf32>
    %110 = tpu.matmul %108, %109, %cst_42 {dimension_numbers = #tpu.dot_dimension_numbers<[1], [0], [0], [1], [0, 0, 1, 1], [], []>} : vector<8x16xf32>, vector<16x64xf32>, vector<8x64xf32> -> vector<8x64xf32>
    %111 = arith.addf %92, %110 : vector<8x64xf32>
    %c0_43 = arith.constant 0 : index
    %c0_44 = arith.constant 0 : index
    %112 = vector.load %arg6[%c0_43, %c0_44] : memref<1x64xf32, #tpu.memory_space<vmem>>, vector<1x64xf32>
    %113 = vector.broadcast %112 : vector<1x64xf32> to vector<8x64xf32>
    %114 = arith.addf %111, %113 : vector<8x64xf32>
    %c0_45 = arith.constant 0 : index
    %c0_46 = arith.constant 0 : index
    %c0_47 = arith.constant 0 : index
    %115 = vector.load %arg7[%c0_45, %c0_46, %c0_47] : memref<1x8x64xf32, #tpu.memory_space<vmem>>, vector<1x8x64xf32>
    %116 = vector.shape_cast %115 : vector<1x8x64xf32> to vector<8x64xf32>
    %117 = vector.shape_cast %114 : vector<8x64xf32> to vector<1x8x64xf32>
    tpu.vector_store %arg7[%c0_45, %c0_46, %c0_47], %117 {strides = array<i32>} : memref<1x8x64xf32, #tpu.memory_space<vmem>>, vector<1x8x64xf32>,
    return
  }
  func.func @transform_0(%arg0: i32) -> (i32, i32, i32) {
    %c0_i32 = arith.constant 0 : i32
    %c0_i32_0 = arith.constant 0 : i32
    %c0_i32_1 = arith.constant 0 : i32
    return %arg0, %c0_i32, %c0_i32_0 : i32, i32, i32
  }
  func.func @transform_1(%arg0: i32) -> (i32, i32) {
    %c0_i32 = arith.constant 0 : i32
    %c0_i32_0 = arith.constant 0 : i32
    %c0_i32_1 = arith.constant 0 : i32
    return %c0_i32, %c0_i32_0 : i32, i32
  }
  func.func @transform_2(%arg0: i32) -> (i32, i32) {
    %c0_i32 = arith.constant 0 : i32
    %c0_i32_0 = arith.constant 0 : i32
    %c0_i32_1 = arith.constant 0 : i32
    return %c0_i32, %c0_i32_0 : i32, i32
  }
  func.func @transform_3(%arg0: i32) -> (i32, i32) {
    %c0_i32 = arith.constant 0 : i32
    %c0_i32_0 = arith.constant 0 : i32
    %c0_i32_1 = arith.constant 0 : i32
    return %c0_i32, %c0_i32_0 : i32, i32
  }
  func.func @transform_4(%arg0: i32) -> (i32, i32) {
    %c0_i32 = arith.constant 0 : i32
    %c0_i32_0 = arith.constant 0 : i32
    %c0_i32_1 = arith.constant 0 : i32
    return %c0_i32, %c0_i32_0 : i32, i32
  }
  func.func @transform_5(%arg0: i32) -> (i32, i32) {
    %c0_i32 = arith.constant 0 : i32
    %c0_i32_0 = arith.constant 0 : i32
    %c0_i32_1 = arith.constant 0 : i32
    return %c0_i32, %c0_i32_0 : i32, i32
  }
  func.func @transform_6(%arg0: i32) -> (i32, i32, i32) {
    %c0_i32 = arith.constant 0 : i32
    %c0_i32_0 = arith.constant 0 : i32
    %c0_i32_1 = arith.constant 0 : i32
    return %arg0, %c0_i32, %c0_i32_0 : i32, i32, i32
  }
}

</mosaic_0001>

<bundles_post_ra>
// kernel: dconv_attention.1
= control target key start
LH: loop header
LB: loop body
LE: loop exit
PB: predicated region body
PF: predicated region fallthrough
CT: control target
= control target key end

     0   :  { %11 = vsyncpa [#allocation3], 0  ;;  %s2221_s0 = inlined_call_operand.vmem [shape: f32[2,8,64], index: 0, kind: input, shape index: {}]   ;;  %s2222_s1 = inlined_call_operand.vmem [shape: f32[64,192], index: 1, kind: input, shape index: {}]   ;;  %s2223_s2 = inlined_call_operand.vmem [shape: f32[3,192], index: 2, kind: input, shape index: {}]   ;;  %s2224_s3 = inlined_call_operand.vmem [shape: f32[1,192], index: 3, kind: input, shape index: {}]   ;;  %s2225_s4 = inlined_call_operand.vmem [shape: f32[64,64], index: 4, kind: input, shape index: {}]   ;;  %s2226_s5 = inlined_call_operand.vmem [shape: f32[1,64], index: 5, kind: input, shape index: {}]   ;;  %s2227_s6 = inlined_call_operand.hbm [shape: f32[2,8,64], index: 6, kind: output, shape index: {}]  }
   0x1   :  { %13 = vsyncpa [#allocation3 + $0x1], 0  ;;  %s1942_s21 = smov 0   ;;  %s1944_s22 = smov 0  }
   0x2   :  { %s1946_s23 = smov 0   ;;  %s1948_s24 = smov 0  }
   0x3 LB: > { %s1963_s25 = sadd.s32 4294967295, %s1894_s24   ;;  %s1608_s26 = sadd.s32 4294967294, %s1894_s24   ;;  %s1894_s24 = sphi %s1948_s24, %s2233_s24   ;;  %s1890_s23 = sphi %s1946_s23, %s2232_s23   ;;  %s1886_s22 = sphi %s1944_s22, %s2231_s22   ;;  %s1882_s21 = sphi %s1942_s21, %s2230_s21  }
   0x4   : > { %s1967_s27 = sadd.s32 1, %s1894_s24   ;;  %s157_s28 = sadd.s32 1, %s1890_s23 }
   0x5   : > { %s154_s29 = ssub.s32 %s1894_s24, %s1967_s27  ;;  %p167_p0 = scmp.ne.s32.totalorder %s1890_s23, %s1886_s22 }
   0x6   : > { %p155_p1 = scmp.eq.s32.totalorder %s154_s29, 0  ;;  %p168_p2 = scmp.eq.s32.totalorder %s1963_s25, 1 }
   0x7   : > { %p173_p3 = scmp.ne.s32.totalorder %s1886_s22, %s1882_s21  ;;  %p174_p4 = scmp.eq.s32.totalorder %s1608_s26, 1 }
   0x8   : > { %s1978_s30 = scalar_select %p155_p1, %s1890_s23, %s157_s28  }
   0x9   : > { %p1980_p5 = por %p168_p2, %p167_p0  ;;  %p1984_p6 = por %p174_p4, %p173_p3 }
   0xa   : > { %p1611_p7 = scmp.ge.s32.totalorder %s1894_s24, 1  ;;  %p214_p8 = scmp.lt.s32.totalorder %s1894_s24, 3 }
   0xc   : > { %p215_p9 = pnand %p1611_p7, %p214_p8 }
   0xd   : > { %v249_v0 = vld [vmem:[%s2222_s1 + $0x8] sm:$0xff] (!%p215_p9)  ;;  %v251_v1 = vld [vmem:[%s2222_s1 + $0x18] sm:$0xff] (!%p215_p9)  ;;  %v248_v2 = vld [vmem:[%s2222_s1] sm:$0xff] (!%p215_p9)  ;;  %v1896_v7 = vmov (!%p215_p9), 0.0   ;;  %p243_p10 = scmp.lt.s32.totalorder (!%p215_p9), %s1963_s25, 1  ;;  %vm264_vm0 = vcmask (!%p215_p9), 523264   ;;  %v339_v26 = vlaneseq (!%p215_p9) }
   0xe   : > { %218 = sbr.rel (%p215_p9) target bundleno = 3365 (0xd25), region = 44  ;;  %v1739_v3 = vpack.c.bf16 (!%p215_p9), %v251_v1, %v249_v0  ;;  %v250_v4 = vld [vmem:[%s2222_s1 + $0x10] sm:$0xff] (!%p215_p9)  ;;  %v253_v5 = vld [vmem:[%s2222_s1 + $0x28] sm:$0xff] (!%p215_p9)  ;;  %v255_v6 = vld [vmem:[%s2222_s1 + $0x38] sm:$0xff] (!%p215_p9)  ;;  %332 = vmatprep.mubr.f32.mxu0 (!%p215_p9), %v1896_v7  ;;  %419 = vmatprep.mubr.f32.mxu1 (!%p215_p9), %v1896_v7  ;;  %vm351_vm2 = vcmask (!%p215_p9), 64512   ;;  %vm1897_vm4 = vmmov (!%p215_p9), 0  }
   0xf   : > { %v1741_v8 = vpack.c.bf16 (!%p215_p9), %v250_v4, %v248_v2  ;;  %v1743_v9 = vpack.c.bf16 (!%p215_p9), %v255_v6, %v253_v5  ;;  %v252_v10 = vld [vmem:[%s2222_s1 + $0x20] sm:$0xff] (!%p215_p9)  ;;  %v254_v11 = vld [vmem:[%s2222_s1 + $0x30] sm:$0xff] (!%p215_p9)  ;;  %v257_v12 = vld [vmem:[%s2222_s1 + $0x48] sm:$0xff] (!%p215_p9)  ;;  %v340_v27 = vshrl.u32 (!%p215_p9), %v339_v26, 7  ;;  %v342_v32 = vand.u32 (!%p215_p9), 127, %v339_v26  ;;  %s1898_s9 = smov (!%p215_p9), 48  }
  0x10   : > { %1740 = vmatprep.subr.bf16.mxu0 (!%p215_p9), %v1739_v3  ;;  %v259_v13 = vld [vmem:[%s2222_s1 + $0x58] sm:$0xff] (!%p215_p9)  ;;  %v1745_v14 = vpack.c.bf16 (!%p215_p9), %v254_v11, %v252_v10  ;;  %v256_v16 = vld [vmem:[%s2222_s1 + $0x40] sm:$0xff] (!%p215_p9)  ;;  %v258_v17 = vld [vmem:[%s2222_s1 + $0x50] sm:$0xff] (!%p215_p9)  ;;  %s1899_s10 = smov (!%p215_p9), 64   ;;  %vm565_vm5 = vcmask (!%p215_p9), 130048   ;;  %s1900_s11 = smov (!%p215_p9), 112  }
  0x11   : > { %1742 = vmatpush1.bf16.msra.mxu0 (!%p215_p9), %v1741_v8  ;;  %v1747_v15 = vpack.c.bf16 (!%p215_p9), %v259_v13, %v257_v12  ;;  %v261_v18 = vld [vmem:[%s2222_s1 + $0x68] sm:$0xff] (!%p215_p9)  ;;  %v263_v19 = vld [vmem:[%s2222_s1 + $0x78] sm:$0xff] (!%p215_p9)  ;;  %v1749_v20 = vpack.c.bf16 (!%p215_p9), %v258_v17, %v256_v16  ;;  %v260_v22 = vld [vmem:[%s2222_s1 + $0x60] sm:$0xff] (!%p215_p9)  ;;  %v512_v29 = vsub.s32 (!%p215_p9), 1, %v340_v27  ;;  %v508_v31 = vsub.s32 (!%p215_p9), 0, %v340_v27  ;;  %s1902_s13 = smov (!%p215_p9), 32  }
  0x12   : > { %1744 = vmatprep.subr.bf16.mxu0 (!%p215_p9), %v1743_v9  ;;  %v1751_v21 = vpack.c.bf16 (!%p215_p9), %v263_v19, %v261_v18  ;;  %v262_v23 = vld [vmem:[%s2222_s1 + $0x70] sm:$0xff] (!%p215_p9)  ;;  %v1620_v28 = vld [vmem:[%s2223_s2 + $0x1] ss:$4 sm:$0x3] (!%p215_p9)  ;;  %v1615_v33 = vadd.s32 (!%p215_p9), 4294967295, %v340_v27  ;;  %v347_v35 = vadd.s32 (!%p215_p9), 1, %v340_v27 }
  0x13   : > { %v1753_v24 = vpack.c.bf16 (!%p215_p9), %v262_v23, %v260_v22  ;;  %v526_v30 = vrot.slane (!%p215_p9), %v1620_v28, %v512_v29  ;;  %v522_v34 = vrot.slane (!%p215_p9), %v1620_v28, %v508_v31  ;;  %v500_v42 = vld [vmem:[%s2223_s2] ss:$4 sm:$0x3] (!%p215_p9)  ;;  %v1621_v44 = vld [vmem:[%s2223_s2 + $0x2] ss:$4 sm:$0x3] (!%p215_p9) }
  0x14   : > { %vm344_vm1 = vcmp.eq.s32.totalorder (!%p215_p9), %v342_v32, %v1615_v33  ;;  %vm348_vm3 = vcmp.eq.s32.totalorder (!%p215_p9), %v342_v32, %v347_v35  ;;  %v513_v43 = vrot.slane (!%p215_p9), %v500_v42, %v512_v29  ;;  %v541_v45 = vrot.slane (!%p215_p9), %v1621_v44, %v512_v29  ;;  %v548_v46 = vld [vmem:[%s2224_s3] sm:$0x3] (!%p215_p9)  ;;  %v726_v35 = vld [vmem:[%s2225_s4 + $0x8] sm:$0xff] (!%p215_p9)  ;;  %s1905_s29 = smov (!%p215_p9), 16   ;;  %s240_s17 = sand.u32 (!%p215_p9), 1, %s1886_s22  }
  0x15   : > { %s244_s28 = scalar_select %p243_p10, %s1963_s25, 1  ;;  %1746 = vmatpush1.bf16.msra.mxu0 %v1745_v14  ;;  %v1616_v39 = vsel %vm344_vm1, 1.0, %v1896_v7  ;;  %v1617_v41 = vsel %vm348_vm3, 1.0, %v1896_v7  ;;  %v557_v47 = vrot.slane %v548_v46, %v512_v29  ;;  %v509_v48 = vrot.slane %v500_v42, %v508_v31  ;;  %v894_v29 = vld [vmem:[%s2225_s4 + $0x10] sm:$0xff] }
  0x16   : > { %1748 = vmatprep.subr.bf16.mxu0 %v1747_v15  ;;  %v537_v52 = vrot.slane %v1621_v44, %v508_v31  ;;  %v553_v58 = vrot.slane %v548_v46, %v508_v31  ;;  %v1903_v28 = vmov 0.0|0.0   ;;  %s1612_s18 = sshll.u32 %s240_s17, 3  ;;  %s1640_s26 = sshll.u32 %s1963_s25, 7 }
  0x17   : > { %s1613_s12 = sshll.u32 %s244_s28, 3  ;;  %s1904_s28 = smov 80  }
  0x18   : > { %s246_s15 = scalar_lea.vmem %s2221_s0, %s1613_s12  ;;  %s1901_s12 = smov 96  }
  0x19   : > { %1750 = vmatpush1.bf16.msra.mxu0 %v1749_v20  ;;  %v247_v25 = vld [vmem:[%s246_s15] sm:$0xff]  ;;  %s1906_s25 = smov [#allocation2]  }
  0x1a   : > { %1752 = vmatprep.subr.bf16.mxu0 %v1751_v21  ;;  %s1836_s14 = sshll.u32 %s1906_s25, 4  ;;  %s1837_s14 = int_to_ptr.vmem [resolvable:$false] %s1836_s14 }
  0x1b   : > { %s1838_s15 = scalar_lea.vmem %s1837_s14, 256 }
  0x1d   : > { %1754 = vmatpush1.bf16.msra.mxu0 %v1753_v24 }
  0x1e   : > { %1686 = vmatprep.subr.mxu0 %v1896_v7 }
  0x20   : > { %1614 = vmatmul.mubr.msk.f32.vlgmr.msra.gmra.mrb[0].mxu0 %vm264_vm0, %v247_v25 }
  0x21   : > { %1688 = vmatprep.mubr.msk.f32.mxu0 %vm1897_vm4, %v1896_v7 }
  0xf3   : > { %v334_v36 = vpop.f32.mrb[0].mxu0 }
  0xf4   : > { %v529_v37 = vmul.f32 %v522_v34, %v334_v36  ;;  %v336_v38 = vpop.f32.mrb[1].mxu0  ;;  %v725_v34 = vld [vmem:[%s2225_s4] sm:$0xff] }
  0xf5   : > { %v530_v40 = vmul.f32 %v526_v30, %v336_v38  ;;  %355 = vmatprep.subr.mxu1 %v336_v38  ;;  %v895_v30 = vld [vmem:[%s2225_s4 + $0x18] sm:$0xff] }
  0xf6   : > { %356 = vmatpush1.msra.mxu1 %v334_v36  ;;  %v1756_v31 = vpack.c.bf16 %v895_v30, %v894_v29 }
  0xf7   : > { %1618 = vmatmul.mubr.msk.f32.vlgmr.msra.gmra.mrb[0].mxu1 %vm351_vm2, %v1616_v39  ;;  %429 = vmatprep.subr.mxu1 %v336_v38 }
  0xf8   : > { %430 = vmatpush1.msra.mxu1 %v334_v36  ;;  %493 = vmatprep.mubr.f32.mxu1 %v1896_v7 }
  0xf9   : > { %1671 = vmatprep.subr.mxu1 %v1896_v7 }
  0xfb   : > { %1619 = vmatmul.mubr.msk.f32.vlgmr.msra.gmra.mrb[2].mxu1 %vm351_vm2, %v1617_v41 }
  0xfc   : > { %1673 = vmatprep.mubr.msk.f32.mxu1 %vm1897_vm4, %v1896_v7 }
 0x1ca   : > { %v421_v49 = vpop.f32.mrb[0].mxu1 }
 0x1cb   : > { %v516_v50 = vmul.f32 %v509_v48, %v421_v49  ;;  %v423_v51 = vpop.f32.mrb[1].mxu1 }
 0x1cc   : > { %v517_v53 = vmul.f32 %v513_v43, %v423_v51 }
 0x1cd   : > { %v531_v54 = vadd.f32 %v529_v37, %v516_v50  ;;  %v1759_v37 = vpack.c.bf16 %v726_v35, %v725_v34 }
 0x1ce   : > { %v532_v55 = vadd.f32 %v530_v40, %v517_v53  ;;  %v495_v56 = vpop.f32.mrb[2].mxu1 }
 0x1cf   : > { %v544_v57 = vmul.f32 %v537_v52, %v495_v56  ;;  %v497_v59 = vpop.f32.mrb[3].mxu1 }
 0x1d0   : > { %v545_v60 = vmul.f32 %v541_v45, %v497_v59  ;;  %v1209_v59 = vld [vmem:[%s2225_s4 + $0x28] sm:$0xff] }
 0x1d1   : > { %v546_v61 = vadd.f32 %v544_v57, %v531_v54 }
 0x1d2   : > { %v547_v62 = vadd.f32 %v545_v60, %v532_v55 }
 0x1d3   : > { %v2069_v63 = vadd.f32 %v553_v58, %v546_v61  ;;  %v1208_v58 = vld [vmem:[%s2225_s4 + $0x20] sm:$0xff] }
 0x1d4   : > { %v2071_v0 = vadd.f32 %v557_v47, %v547_v62  ;;  %v1762_v60 = vpack.c.bf16 %v1209_v59, %v1208_v58 }
 0x1d5   : > { %729 = vrot.lane.b32.xlu1 %v2069_v63, %s1898_s9  ;;  %563 = vrot.lane.b32.xlu0 %v2069_v63, %s1899_s10 }
 0x247   : > { %v564_v1 = vpop.permute.xlu0 %563  ;;  %v730_v12 = vpop.permute.xlu1 %729 }
 0x248   : > { %1672 = vmatpush3.xpose.msk.msra.mxu1 %vm565_vm5, %v564_v1 }
 0x249   : > { %1676 = vmatprep.subr.mxu1 %v1896_v7 }
 0x24b   : > { %1674 = vmatmul.mubr.msk.f32.vlgmr.msra.gmra.mrb[4].mxu1 %vm565_vm5, %v2069_v63 }
 0x24c   : > { %1677 = vmatpush3.msra.mxu1 %v2071_v0  ;;  %1678 = vmatprep.mubr.msk.f32.mxu1 %vm1897_vm4, %v1896_v7 }
 0x24d   : > { %1681 = vmatprep.subr.mxu1 %v1896_v7 }
 0x31e   : > { %v636_v2 = vpop.f32.mrb[4].mxu1 }
 0x31f   : > { %v640_v3 = vmul.f32 0.25, %v636_v2  ;;  %v1675_v4 = vpop.f32.mrb[5].mxu1 }
 0x321   : > { %v641_v5 = vsel %vm351_vm2, %v640_v3, -inf }
 0x322   : > { %642 = vmax.xlane.f32.xlu0 %v641_v5 }
 0x3af   : > { %v643_v6 = vpop.xlane.xlu0 %642 }
 0x3b0   : > { %v644_v8 = vsub.f32 %v640_v3, %v643_v6 }
 0x3b2   : > { %v645_v9 = vmul.f32 1.442695, %v644_v8 }
 0x3b4   : > { %1816 = vpow2.f32 %v645_v9 }
 0x3be   : > { %v1817_v10 = vpop.eup %1816 }
 0x3bf   : > { %v647_v11 = vsel %vm351_vm2, %v1817_v10, 0.0 }
 0x3c0   : > { %648 = vadd.xlane.f32.xlu1 %v647_v11 }
 0x3d1   : > { %727 = vrot.lane.b32.xlu1 %v2069_v63, %s1900_s11 }
 0x44d   : > { %v649_v13 = vpop.xlane.xlu1 %648 }
 0x44e   : > { %1818 = vrcp.f32 %v649_v13 }
 0x451   : > { %v728_v16 = vpop.permute.xlu1 %727 }
 0x458   : > { %v1819_v14 = vpop.eup %1818 }
 0x459   : > { %v651_v15 = vmul.f32 %v1819_v14, %v1817_v10 }
 0x45b   : > { %1679 = vmatmul.mubr.msk.f32.vlgmr.msra.gmra.mrb[6].mxu1 %vm351_vm2, %v651_v15 }
 0x45c   : > { %1682 = vmatpush3.xpose.msk.msra.mxu1 %vm565_vm5, %v730_v12  ;;  %1683 = vmatprep.mubr.msk.f32.mxu1 %vm1897_vm4, %v1896_v7 }
 0x45d   : > { %1755 = vmatprep.subr.bf16.mxu1 %v1903_v28 }
 0x45f   : > { %1684 = vmatmul.mubr.msk.f32.vlgmr.msra.gmra.mrb[8].mxu1 %vm565_vm5, %v728_v16  ;;  %v1451_v16 = vld [vmem:[%s2225_s4 + $0x38] sm:$0xff] }
 0x460   : > { %1695 = vmatprep.mubr.msk.f32.mxu1 %vm1897_vm4, %v1896_v7  ;;  %1757 = vmatpush3.bf16.msra.mxu1 %v1756_v31 }
 0x461   : > { %1705 = vmatprep.subr.mxu1 %v1896_v7 }
 0x52e   : > { %v721_v17 = vpop.f32.mrb[6].mxu1 }
 0x52f   : > { %v1680_v18 = vpop.f32.mrb[7].mxu1 }
 0x532   : > { %v801_v19 = vpop.f32.mrb[8].mxu1 }
 0x533   : > { %v805_v20 = vmul.f32 0.25, %v801_v19  ;;  %v1685_v21 = vpop.f32.mrb[9].mxu1 }
 0x535   : > { %v806_v22 = vsel %vm351_vm2, %v805_v20, -inf }
 0x536   : > { %807 = vmax.xlane.f32.xlu1 %v806_v22 }
 0x547   : > { %1042 = vrot.lane.b32.xlu1 %v2069_v63, %s1901_s12 }
 0x5c3   : > { %v808_v23 = vpop.xlane.xlu1 %807 }
 0x5c4   : > { %v809_v24 = vsub.f32 %v805_v20, %v808_v23 }
 0x5c6   : > { %v810_v25 = vmul.f32 1.442695, %v809_v24 }
 0x5c7   : > { %v1043_v42 = vpop.permute.xlu1 %1042 }
 0x5c8   : > { %1820 = vpow2.f32 %v810_v25 }
 0x5d2   : > { %v1821_v26 = vpop.eup %1820 }
 0x5d3   : > { %v812_v27 = vsel %vm351_vm2, %v1821_v26, 0.0 }
 0x5d4   : > { %813 = vadd.xlane.f32.xlu0 %v812_v27 }
 0x5ea   : > { %818 = vrot.lane.b32.xlu0 %v2071_v0, %s1900_s11  ;;  %s2178_s11 = scalar_lea.hbm %s2227_s6, %s1640_s26 }
 0x5ee   : > { %1044 = vrot.lane.b32.xlu0 %v2069_v63, %s1902_s13 }
 0x661   : > { %v814_v32 = vpop.xlane.xlu0 %813 }
 0x662   : > { %1822 = vrcp.f32 %v814_v32 }
 0x665   : > { %v819_v33 = vpop.permute.xlu0 %818 }
 0x666   : > { %1687 = vmatpush3.msra.mxu0 %v819_v33 }
 0x667   : > { %1758 = vmatprep.subr.bf16.mxu0 %v1903_v28 }
 0x669   : > { %v1045_v40 = vpop.permute.xlu0 %1044 }
 0x66c   : > { %v1823_v36 = vpop.eup %1822 }
 0x66d   : > { %v816_v38 = vmul.f32 %v1823_v36, %v1821_v26  ;;  %v1638_v26 = vld [vmem:[%s2226_s5] ss:$0 sm:$0xff] }
 0x66f   : > { %1689 = vmatmul.mubr.msk.f32.vlgmr.msra.gmra.mrb[2].mxu0 %vm351_vm2, %v816_v38 }
 0x670   : > { %1760 = vmatpush3.bf16.msra.mxu0 %v1759_v37  ;;  %1702 = vmatprep.mubr.msk.f32.mxu0 %vm1897_vm4, %v1896_v7 }
 0x671   : > { %1710 = vmatprep.subr.mxu0 %v1896_v7 }
 0x673   : > { %1703 = vmatmul.mubr.msk.f32.vlgmr.msra.gmra.mrb[4].mxu0 %vm565_vm5, %v721_v17 }
 0x674   : > { %1712 = vmatprep.mubr.msk.f32.mxu0 %vm1897_vm4, %v1896_v7 }
 0x742   : > { %v890_v39 = vpop.f32.mrb[2].mxu0 }
 0x743   : > { %v1690_v41 = vpop.f32.mrb[3].mxu0  ;;  %1696 = vmatmul.mubr.msk.f32.vlgmr.msra.gmra.mrb[10].mxu1 %vm565_vm5, %v890_v39 }
 0x744   : > { %1706 = vmatpush3.xpose.msk.msra.mxu1 %vm565_vm5, %v1045_v40  ;;  %1707 = vmatprep.mubr.msk.f32.mxu1 %vm1897_vm4, %v1896_v7 }
 0x745   : > { %1761 = vmatprep.subr.bf16.mxu1 %v1903_v28 }
 0x746   : > { %v1038_v43 = vpop.f32.mrb[4].mxu0 }
 0x747   : > { %v1704_v44 = vpop.f32.mrb[5].mxu0  ;;  %1708 = vmatmul.mubr.msk.f32.vlgmr.msra.gmra.mrb[12].mxu1 %vm565_vm5, %v1043_v42 }
 0x748   : > { %1719 = vmatprep.mubr.msk.f32.mxu1 %vm1897_vm4, %v1896_v7  ;;  %1763 = vmatpush3.bf16.msra.mxu1 %v1762_v60 }
 0x749   : > { %1727 = vmatprep.subr.mxu1 %v1896_v7 }
 0x816   : > { %v965_v45 = vpop.f32.mrb[10].mxu1 }
 0x817   : > { %v2129_v46 = vadd.f32 %v1038_v43, %v965_v45  ;;  %v1697_v47 = vpop.f32.mrb[11].mxu1 }
 0x81a   : > { %v1116_v48 = vpop.f32.mrb[12].mxu1 }
 0x81b   : > { %v1120_v49 = vmul.f32 0.25, %v1116_v48  ;;  %v1709_v50 = vpop.f32.mrb[13].mxu1 }
 0x81d   : > { %v1121_v51 = vsel %vm351_vm2, %v1120_v49, -inf }
 0x81e   : > { %1122 = vmax.xlane.f32.xlu0 %v1121_v51 }
 0x834   : > { %1132 = vrot.lane.b32.xlu0 %v2071_v0, %s1901_s12  ;;  %s1536_s12 = scalar_lea.sflag [#allocation3], %s240_s17 }
 0x838   : > { %1284 = vrot.lane.b32.xlu0 %v2069_v63, %s1904_s28 }
 0x8ab   : > { %v1123_v52 = vpop.xlane.xlu0 %1122 }
 0x8ac   : > { %v1124_v53 = vsub.f32 %v1120_v49, %v1123_v52 }
 0x8ae   : > { %v1125_v54 = vmul.f32 1.442695, %v1124_v53 }
 0x8af   : > { %v1133_v55 = vpop.permute.xlu0 %1132 }
 0x8b0   : > { %1824 = vpow2.f32 %v1125_v54  ;;  %1711 = vmatpush3.msra.mxu0 %v1133_v55 }
 0x8b1   : > { %1722 = vmatprep.subr.mxu0 %v1896_v7 }
 0x8ba   : > { %v1825_v56 = vpop.eup %1824 }
 0x8bb   : > { %v1127_v57 = vsel %vm351_vm2, %v1825_v56, 0.0 }
 0x8bc   : > { %1128 = vadd.xlane.f32.xlu1 %v1127_v57 }
 0x8cd   : > { %1286 = vrot.lane.b32.xlu1 %v2069_v63, %s1905_s29  ;;  %v1285_v63 = vpop.permute.xlu0 %1284 }
 0x949   : > { %v1129_v61 = vpop.xlane.xlu1 %1128 }
 0x94a   : > { %1826 = vrcp.f32 %v1129_v61 }
 0x94d   : > { %v1287_v2 = vpop.permute.xlu1 %1286 }
 0x954   : > { %v1827_v62 = vpop.eup %1826 }
 0x955   : > { %v1131_v1 = vmul.f32 %v1827_v62, %v1825_v56 }
 0x957   : > { %1713 = vmatmul.mubr.msk.f32.vlgmr.msra.gmra.mrb[6].mxu0 %vm351_vm2, %v1131_v1 }
 0x958   : > { %1723 = vmatpush3.xpose.msk.msra.mxu0 %vm565_vm5, %v1287_v2  ;;  %1724 = vmatprep.mubr.msk.f32.mxu0 %vm1897_vm4, %v1896_v7 }
 0x959   : > { %1764 = vmatprep.subr.bf16.mxu0 %v1903_v28 }
 0x95b   : > { %1725 = vmatmul.mubr.msk.f32.vlgmr.msra.gmra.mrb[8].mxu0 %vm565_vm5, %v1285_v63 }
 0x95c   : > { %1736 = vmatprep.mubr.msk.f32.mxu0 %vm1897_vm4, %v1896_v7 }
 0xa2a   : > { %v1204_v3 = vpop.f32.mrb[6].mxu0 }
 0xa2b   : > { %v1714_v4 = vpop.f32.mrb[7].mxu0  ;;  %1720 = vmatmul.mubr.msk.f32.vlgmr.msra.gmra.mrb[14].mxu1 %vm565_vm5, %v1204_v3 }
 0xa2c   : > { %1729 = vmatprep.mubr.msk.f32.mxu1 %vm1897_vm4, %v1896_v7  ;;  %v1450_v7 = vld [vmem:[%s2225_s4 + $0x30] sm:$0xff] }
 0xa2e   : > { %v1358_v5 = vpop.f32.mrb[8].mxu0 }
 0xa2f   : > { %v1362_v6 = vmul.f32 0.25, %v1358_v5  ;;  %v1726_v8 = vpop.f32.mrb[9].mxu0 }
 0xa31   : > { %v1363_v9 = vsel %vm351_vm2, %v1362_v6, -inf }
 0xa32   : > { %1364 = vmax.xlane.f32.xlu0 %v1363_v9 }
 0xa48   : > { %1374 = vrot.lane.b32.xlu0 %v2071_v0, %s1904_s28  ;;  %v1765_v0 = vpack.c.bf16 %v1451_v16, %v1450_v7  ;;  %s242_s28 = scalar_lea.vmem [#allocation2], %s1612_s18 }
 0xa49   : > { %s1549_s29 = sshll.u32 %s242_s28, 4  ;;  %s2180_s29 = int_to_ptr.vmem [resolvable:$true] %s1549_s29 }
 0xa4a   : > { %1766 = vmatpush3.bf16.msra.mxu0 %v1765_v0  ;;  %s1832_s13 = scalar_lea.vmem %s2180_s29, 128  ;;  %p1839_p0 = scmp.lt.s32.totalorder %s2180_s29, %s1837_s14 }
 0xa4b   : > { %p1833_p11 = scmp.ne.s32.totalorder %s2180_s29, %s1832_s13  ;;  %p1840_p1 = scmp.lt.s32.totalorder %s1838_s15, %s1832_s13 }
 0xa4d   : > { %p1834_p12 = pnand %p1833_p11, %p1980_p5  ;;  %p1841_p2 = por %p1840_p1, %p1839_p0 }
 0xa4f   : > { %p1835_p13 = pneg %p1834_p12 }
 0xa51   : > { %p1842_p3 = pnand %p1841_p2, %p1835_p13 }
 0xabf   : > { %v1365_v10 = vpop.xlane.xlu0 %1364 }
 0xac0   : > { %v1366_v11 = vsub.f32 %v1362_v6, %v1365_v10 }
 0xac2   : > { %v1367_v12 = vmul.f32 1.442695, %v1366_v11 }
 0xac3   : > { %v1375_v13 = vpop.permute.xlu0 %1374 }
 0xac4   : > { %1828 = vpow2.f32 %v1367_v12  ;;  %1728 = vmatpush3.msra.mxu1 %v1375_v13 }
 0xace   : > { %v1829_v14 = vpop.eup %1828 }
 0xacf   : > { %v1369_v15 = vsel %vm351_vm2, %v1829_v14, 0.0 }
 0xad0   : > { %1370 = vadd.xlane.f32.xlu1 %v1369_v15 }
 0xafe   : > { %v1279_v17 = vpop.f32.mrb[14].mxu1 }
 0xaff   : > { %v1283_v18 = vadd.f32 %v1279_v17, %v2129_v46  ;;  %v1721_v19 = vpop.f32.mrb[15].mxu1 }
 0xb5d   : > { %v1371_v20 = vpop.xlane.xlu1 %1370 }
 0xb5e   : > { %1830 = vrcp.f32 %v1371_v20 }
 0xb68   : > { %v1831_v21 = vpop.eup %1830 }
 0xb69   : > { %v1373_v22 = vmul.f32 %v1831_v21, %v1829_v14 }
 0xb6b   : > { %1730 = vmatmul.mubr.msk.f32.vlgmr.msra.gmra.mrb[16].mxu1 %vm351_vm2, %v1373_v22 }
 0xc3e   : > { %v1446_v23 = vpop.f32.mrb[16].mxu1 }
 0xc3f   : > { %v1731_v24 = vpop.f32.mrb[17].mxu1  ;;  %1737 = vmatmul.mubr.msk.f32.vlgmr.msra.gmra.mrb[10].mxu0 %vm565_vm5, %v1446_v23 }
 0xd12   : > { %v1521_v25 = vpop.f32.mrb[10].mxu0 }
 0xd13   : > { %v1525_v27 = vadd.f32 %v1521_v25, %v1283_v18  ;;  %v1738_v28 = vpop.f32.mrb[11].mxu0 }
 0xd15   : > { %v1533_v29 = vadd.f32 %v1638_v26, %v1525_v27 }
 0xd17   : > { %1534 = vst.msk [vmem:[%s242_s28] sm:$0xff] %vm264_vm0, %v1533_v29 }
 0xd18   : > { %1845 = shalt.err (!%p1842_p3)
}
 0xd19   : > { %s1846_s16 = scalar_lea.hbm %s2178_s11, 128  ;;  %s1850_s19 = scalar_lea.hbm %s2227_s6, 256 }
 0xd1a   : > { %p1847_p4 = scmp.ne.s32.totalorder %s2178_s11, %s1846_s16  ;;  %p1851_p9 = scmp.lt.u32.totalorder %s2178_s11, %s2227_s6 }
 0xd1b   : > { %p1852_p10 = scmp.lt.u32.totalorder %s1850_s19, %s1846_s16  ;;  %p1854_p12 = scmp.lt.u32.totalorder %s1846_s16, %s2178_s11 }
 0xd1c   : > { %p1848_p7 = pnand %p1847_p4, %p1980_p5 }
 0xd1d   : > { %p1853_p11 = por %p1852_p10, %p1851_p9 }
 0xd1e   : > { %p1849_p8 = pneg %p1848_p7 }
 0xd1f   : > { %p1855_p13 = por %p1854_p12, %p1853_p11 }
 0xd21   : > { %p1856_p0 = pnand %p1855_p13, %p1849_p8 }
 0xd23   : > { %1859 = shalt.err (!%p1856_p0)
}
 0xd24   : > { %1767 = dma.vmem_to_hbm [thread:$0]  (%p1980_p5), %s2180_s29, 128, %s2178_s11, %s1536_s12  }
 0xd25 PF: > { %p1773_p1 = scmp.ge.s32.totalorder %s1894_s24, 2  ;;  %s1561_s28 = sand.u32 1, %s1882_s21  }
 0xd26   : > { %s1562_s9 = scalar_lea.sflag [#allocation3], %s1561_s28 }
 0xd27   : > { %p1770_p2 = pnand %p1773_p1, %p1984_p6 }
 0xd29   : > { %1877 = dma.done.wait (!%p1770_p2), %s1562_s9, 128  }
 0xd2a   : > { %1879 = vsyncadd (!%p1770_p2), %s1562_s9, 4294967168  ;;  %p16_p3 = scmp.ge.s32.totalorder %s1967_s27, 4   ;;  %s2230_s21 = smov %s1886_s22 }
 0xd2b   : > { %s2231_s22 = smov %s1890_s23  ;;  %s2232_s23 = smov %s1978_s30 }
 0xd2c   : > { %s2233_s24 = smov %s1967_s27  ;;  %18 = sbr.rel (!%p16_p3) target bundleno = 3 (0x3), region = 81 }
 0xd33   :  { %1567 = vsyncpa [#allocation3], 1 }
 0xd34   :  { %1569 = vsyncpa [#allocation3 + $0x1], 1 }

</bundles_post_ra>
